<compile_context>
chip_gen: v7x
topology: tpu7x:2x2x1
jax: 0.10.0
libtpu: 0.0.40
codegen_flags: <defaults>
</compile_context>

<pallas_src>
import functools

import jax
import jax.numpy as jnp
from jax.experimental import pallas as pl
from jax.experimental.pallas import tpu as pltpu


def _softplus(x):
    # Numerically-stable softplus (log1p form), matches torch.nn.functional.softplus.
    return jnp.maximum(x, 0.0) + jnp.log1p(jnp.exp(-jnp.abs(x)))


def _velocity_kernel(y_ref, y0_ref, g_ref,
                     w1a_ref, w1b_ref, b1_ref,
                     w23_ref, b23_ref, w4_ref, b4_ref,
                     out_ref):
    """One batch tile (TB samples -> TB*L fused rows) per grid step.

    y_ref, y0_ref : [TB, L, D]   current state / conditioning mean
    g_ref         : [TB, 3, H]   packed per-sample gammas (gamma1..3)
    w/b refs      : weights / biases (full blocks, resident in VMEM)
    out_ref       : [TB, L, D]   velocity dy/dt
    """
    TB, L, D = y_ref.shape
    H = w1a_ref.shape[1]
    R = TB * L

    # Fuse (batch, pred_len) into the sublane (row) axis: [TB,L,D] -> [R,D].
    y = y_ref[...].astype(jnp.float32).reshape(R, D)
    y0 = y0_ref[...].astype(jnp.float32).reshape(R, D)

    # Per-sample gamma -> per-row gamma (sublane broadcast, done once each).
    def row_gamma(i):
        g = g_ref[:, i, :].astype(jnp.float32)                 # [TB, H]
        return jnp.broadcast_to(g[:, None, :], (TB, L, H)).reshape(R, H)

    g1 = row_gamma(0)
    g2 = row_gamma(1)
    g3 = row_gamma(2)

    # ConditionalLinear #1 — concat([y, y0], -1) replaced by split matmuls.
    z1 = (jnp.dot(y, w1a_ref[...], preferred_element_type=jnp.float32)
          + jnp.dot(y0, w1b_ref[...], preferred_element_type=jnp.float32)
          + b1_ref[...])
    h1 = _softplus(z1 * g1)

    # ConditionalLinear #2 / #3 (stacked weights, static first-dim index).
    h2 = _softplus((jnp.dot(h1, w23_ref[0], preferred_element_type=jnp.float32)
                    + b23_ref[0]) * g2)
    h3 = _softplus((jnp.dot(h2, w23_ref[1], preferred_element_type=jnp.float32)
                    + b23_ref[1]) * g3)

    # Final plain Linear -> velocity; one coalesced [TB, L, D] store.
    vel = jnp.dot(h3, w4_ref[...], preferred_element_type=jnp.float32) + b4_ref[...]
    out_ref[...] = vel.reshape(TB, L, D).astype(out_ref.dtype)


def _velocity_pallas(y, y_0_hat, gammas, params):
    B, L, D = y.shape
    H = params["emb1"].shape[1]
    out_dtype = y.dtype

    # Wrapper-side weight plumbing (tiny, done once per call).
    w1a = params["w1"][:D]                                      # [D, H]
    w1b = params["w1"][D:]                                      # [D, H]
    w23 = jnp.stack([params["w2"], params["w3"]], axis=0)       # [2, H, H]
    b23 = jnp.stack([params["b2"], params["b3"]], axis=0)       # [2, 1, H]

    # Batch tile: target ~256 fused rows (TB * L) per grid step.
    TB = max(1, min(B, 256 // max(L, 1)))
    num_tiles = pl.cdiv(B, TB)
    Bp = num_tiles * TB
    if Bp != B:
        pad = ((0, Bp - B), (0, 0), (0, 0))
        y = jnp.pad(y, pad)
        y_0_hat = jnp.pad(y_0_hat, pad)
        gammas = jnp.pad(gammas, pad)

    batch_spec = pl.BlockSpec((TB, L, D), lambda b: (b, 0, 0))
    gamma_spec = pl.BlockSpec((TB, 3, H), lambda b: (b, 0, 0))

    def full_spec(shape):
        return pl.BlockSpec(shape, lambda b, n=len(shape): (0,) * n)

    in_specs = [
        batch_spec,                                   # y        [Bp, L, D]
        batch_spec,                                   # y_0_hat  [Bp, L, D]
        gamma_spec,                                   # gammas   [Bp, 3, H]
        full_spec(w1a.shape), full_spec(w1b.shape), full_spec(params["b1"].shape),
        full_spec(w23.shape), full_spec(b23.shape),
        full_spec(params["w4"].shape), full_spec(params["b4"].shape),
    ]

    out = pl.pallas_call(
        _velocity_kernel,
        out_shape=jax.ShapeDtypeStruct((Bp, L, D), out_dtype),
        grid_spec=pltpu.PrefetchScalarGridSpec(
            num_scalar_prefetch=0,
            grid=(num_tiles,),
            in_specs=in_specs,
            out_specs=batch_spec,
        ),
        compiler_params=pltpu.CompilerParams(
            dimension_semantics=("parallel",)),
    )(y, y_0_hat, gammas, w1a, w1b, params["b1"], w23, b23,
      params["w4"], params["b4"])

    return out[:B] if Bp != B else out


def ode_func_forward(t, y, x, x_mark, y_0_hat, params, *,
                     num_timesteps, cov_embedding=None):
    """JAX/Pallas equivalent of ODEFunc.forward(t, y)."""
    del x, x_mark, cov_embedding  # see TODO(synk) at top of file

    # --- exact ODEFunc.forward semantics for t ---
    t = jnp.asarray(t, dtype=y.dtype)
    if t.ndim == 0:
        t = jnp.broadcast_to(t, (y.shape[0],))
    # (t * (N-1)).long().clamp(0, N-1) — .long() truncates toward zero.
    t_discrete = jnp.clip((t * (num_timesteps - 1)).astype(jnp.int32),
                          0, num_timesteps - 1)

    # Packed per-sample timestep embeddings gamma1..3 -> [B, 3, H] (one gather op,
    # one DMA per grid step inside the kernel).
    gammas = jnp.stack([params["emb1"][t_discrete],
                        params["emb2"][t_discrete],
                        params["emb3"][t_discrete]], axis=1)

    return _velocity_pallas(y, y_0_hat, gammas, params)


def init_params(key, d_in, hidden, num_timesteps):
    """Deterministic synthetic weights (PyTorch-Linear-style uniform init)."""
    ks = jax.random.split(key, 12)

    def lin(kw, kb, fan_in, fan_out):
        bound = 1.0 / jnp.sqrt(fan_in)
        w = jax.random.uniform(kw, (fan_in, fan_out), jnp.float32, -bound, bound)
        b = jax.random.uniform(kb, (1, fan_out), jnp.float32, -bound, bound)
        return w, b

    w1, b1 = lin(ks[0], ks[1], 2 * d_in, hidden)
    w2, b2 = lin(ks[2], ks[3], hidden, hidden)
    w3, b3 = lin(ks[4], ks[5], hidden, hidden)
    w4, b4 = lin(ks[6], ks[7], hidden, d_in)
    # Embedding tables init to ~1 (gamma modulation), like CARD's ones_ init.
    emb1 = 1.0 + 0.01 * jax.random.normal(ks[8], (num_timesteps, hidden), jnp.float32)
    emb2 = 1.0 + 0.01 * jax.random.normal(ks[9], (num_timesteps, hidden), jnp.float32)
    emb3 = 1.0 + 0.01 * jax.random.normal(ks[10], (num_timesteps, hidden), jnp.float32)
    return dict(w1=w1, b1=b1, w2=w2, b2=b2, w3=w3, b3=b3, w4=w4, b4=b4,
                emb1=emb1, emb2=emb2, emb3=emb3)


def _reference_forward(t, y, y_0_hat, params, num_timesteps):
    """Pure-JAX reference for correctness checking."""
    t = jnp.asarray(t, dtype=y.dtype)
    if t.ndim == 0:
        t = jnp.broadcast_to(t, (y.shape[0],))
    td = jnp.clip((t * (num_timesteps - 1)).astype(jnp.int32),
                  0, num_timesteps - 1)
    g1 = params["emb1"][td][:, None, :]
    g2 = params["emb2"][td][:, None, :]
    g3 = params["emb3"][td][:, None, :]
    h = jnp.concatenate([y, y_0_hat], axis=-1)
    h = jax.nn.softplus((h @ params["w1"] + params["b1"]) * g1)
    h = jax.nn.softplus((h @ params["w2"] + params["b2"]) * g2)
    h = jax.nn.softplus((h @ params["w3"] + params["b3"]) * g3)
    return h @ params["w4"] + params["b4"]


if __name__ == "__main__":
    B, SEQ, L, D, H = 2, 16, 8, 4, 32
    NUM_TIMESTEPS = 100

    key = jax.random.PRNGKey(0)
    kp, kx, km, ky, kyh = jax.random.split(key, 5)

    params = init_params(kp, D, H, NUM_TIMESTEPS)

    x = jax.random.normal(kx, (B, SEQ, D), jnp.float32)       # history
    x_mark = jax.random.normal(km, (B, SEQ, 4), jnp.float32)  # time features
    y = jax.random.normal(ky, (B, L, D), jnp.float32)         # current state
    y_0_hat = jax.random.normal(kyh, (B, L, D), jnp.float32)  # cond. estimate
    t = 0.37                                                  # scalar ODE time

    fwd = functools.partial(ode_func_forward, num_timesteps=NUM_TIMESTEPS)
    velocity = fwd(t, y, x, x_mark, y_0_hat, params)
    velocity = jax.block_until_ready(velocity)

    ref = _reference_forward(t, y, y_0_hat, params, NUM_TIMESTEPS)
    assert velocity.shape == (B, L, D)
    assert velocity.dtype == y.dtype
    assert jnp.allclose(velocity, ref, atol=1e-5, rtol=1e-5)

    print("KERNEL_OK")
</pallas_src>

<mosaic_0001>
module attributes {stable_mosaic.version = 11 : i64} {
  func.func @_velocity_kernel(%arg0: i32, %arg1: memref<2x8x4xf32, #tpu.memory_space<vmem>>, %arg2: memref<2x8x4xf32, #tpu.memory_space<vmem>>, %arg3: memref<2x3x32xf32, #tpu.memory_space<vmem>>, %arg4: memref<4x32xf32, #tpu.memory_space<vmem>>, %arg5: memref<4x32xf32, #tpu.memory_space<vmem>>, %arg6: memref<1x32xf32, #tpu.memory_space<vmem>>, %arg7: memref<2x32x32xf32, #tpu.memory_space<vmem>>, %arg8: memref<2x1x32xf32, #tpu.memory_space<vmem>>, %arg9: memref<32x4xf32, #tpu.memory_space<vmem>>, %arg10: memref<1x4xf32, #tpu.memory_space<vmem>>, %arg11: memref<2x8x4xf32, #tpu.memory_space<vmem>>) attributes {dimension_semantics = [#tpu.dimension_semantics<parallel>], iteration_bounds = array<i64: 1>, scalar_prefetch = 0 : i64, scratch_operands = 0 : i64, tpu.core_type = #tpu.core_type<tc>, window_params = [{transform_indices = @transform_0, window_bounds = array<i64: 2, 8, 4>}, {transform_indices = @transform_1, window_bounds = array<i64: 2, 8, 4>}, {transform_indices = @transform_2, window_bounds = array<i64: 2, 3, 32>}, {pipeline_mode = #tpu.pipeline_mode<synchronous>, transform_indices = @transform_3, window_bounds = array<i64: 4, 32>}, {pipeline_mode = #tpu.pipeline_mode<synchronous>, transform_indices = @transform_4, window_bounds = array<i64: 4, 32>}, {pipeline_mode = #tpu.pipeline_mode<synchronous>, transform_indices = @transform_5, window_bounds = array<i64: 1, 32>}, {pipeline_mode = #tpu.pipeline_mode<synchronous>, transform_indices = @transform_6, window_bounds = array<i64: 2, 32, 32>}, {pipeline_mode = #tpu.pipeline_mode<synchronous>, transform_indices = @transform_7, window_bounds = array<i64: 2, 1, 32>}, {pipeline_mode = #tpu.pipeline_mode<synchronous>, transform_indices = @transform_8, window_bounds = array<i64: 32, 4>}, {pipeline_mode = #tpu.pipeline_mode<synchronous>, transform_indices = @transform_9, window_bounds = array<i64: 1, 4>}, {transform_indices = @transform_10, window_bounds = array<i64: 2, 8, 4>}]} {
    %c0 = arith.constant 0 : index
    %c0_0 = arith.constant 0 : index
    %c0_1 = arith.constant 0 : index
    %0 = vector.load %arg1[%c0, %c0_0, %c0_1] : memref<2x8x4xf32, #tpu.memory_space<vmem>>, vector<2x8x4xf32>
    %1 = vector.shape_cast %0 : vector<2x8x4xf32> to vector<16x4xf32>
    %c0_2 = arith.constant 0 : index
    %c0_3 = arith.constant 0 : index
    %c0_4 = arith.constant 0 : index
    %2 = vector.load %arg2[%c0_2, %c0_3, %c0_4] : memref<2x8x4xf32, #tpu.memory_space<vmem>>, vector<2x8x4xf32>
    %3 = vector.shape_cast %2 : vector<2x8x4xf32> to vector<16x4xf32>
    %c0_5 = arith.constant 0 : index
    %c0_6 = arith.constant 0 : index
    %c0_7 = arith.constant 0 : index
    %4 = vector.load %arg3[%c0_5, %c0_6, %c0_7] : memref<2x3x32xf32, #tpu.memory_space<vmem>>, vector<2x1x32xf32>
    %5 = vector.shape_cast %4 : vector<2x1x32xf32> to vector<2x32xf32>
    %6 = vector.shape_cast %5 : vector<2x32xf32> to vector<2x1x32xf32>
    %7 = vector.shape_cast %6 : vector<2x1x32xf32> to vector<2x1x32xf32>
    %8 = vector.broadcast %7 : vector<2x1x32xf32> to vector<2x8x32xf32>
    %9 = vector.shape_cast %8 : vector<2x8x32xf32> to vector<16x32xf32>
    %c0_8 = arith.constant 0 : index
    %c1 = arith.constant 1 : index
    %c0_9 = arith.constant 0 : index
    %10 = vector.load %arg3[%c0_8, %c1, %c0_9] : memref<2x3x32xf32, #tpu.memory_space<vmem>>, vector<2x1x32xf32>
    %11 = vector.shape_cast %10 : vector<2x1x32xf32> to vector<2x32xf32>
    %12 = vector.shape_cast %11 : vector<2x32xf32> to vector<2x1x32xf32>
    %13 = vector.shape_cast %12 : vector<2x1x32xf32> to vector<2x1x32xf32>
    %14 = vector.broadcast %13 : vector<2x1x32xf32> to vector<2x8x32xf32>
    %15 = vector.shape_cast %14 : vector<2x8x32xf32> to vector<16x32xf32>
    %c0_10 = arith.constant 0 : index
    %c2 = arith.constant 2 : index
    %c0_11 = arith.constant 0 : index
    %16 = vector.load %arg3[%c0_10, %c2, %c0_11] : memref<2x3x32xf32, #tpu.memory_space<vmem>>, vector<2x1x32xf32>
    %17 = vector.shape_cast %16 : vector<2x1x32xf32> to vector<2x32xf32>
    %18 = vector.shape_cast %17 : vector<2x32xf32> to vector<2x1x32xf32>
    %19 = vector.shape_cast %18 : vector<2x1x32xf32> to vector<2x1x32xf32>
    %20 = vector.broadcast %19 : vector<2x1x32xf32> to vector<2x8x32xf32>
    %21 = vector.shape_cast %20 : vector<2x8x32xf32> to vector<16x32xf32>
    %c0_12 = arith.constant 0 : index
    %c0_13 = arith.constant 0 : index
    %22 = vector.load %arg4[%c0_12, %c0_13] : memref<4x32xf32, #tpu.memory_space<vmem>>, vector<4x32xf32>
    %cst = arith.constant dense<0.000000e+00> : vector<16x32xf32>
    %23 = tpu.matmul %1, %22, %cst {dimension_numbers = #tpu.dot_dimension_numbers<[1], [0], [0], [1], [0, 0, 1, 1], [], []>} : vector<16x4xf32>, vector<4x32xf32>, vector<16x32xf32> -> vector<16x32xf32>
    %c0_14 = arith.constant 0 : index
    %c0_15 = arith.constant 0 : index
    %24 = vector.load %arg5[%c0_14, %c0_15] : memref<4x32xf32, #tpu.memory_space<vmem>>, vector<4x32xf32>
    %cst_16 = arith.constant dense<0.000000e+00> : vector<16x32xf32>
    %25 = tpu.matmul %3, %24, %cst_16 {dimension_numbers = #tpu.dot_dimension_numbers<[1], [0], [0], [1], [0, 0, 1, 1], [], []>} : vector<16x4xf32>, vector<4x32xf32>, vector<16x32xf32> -> vector<16x32xf32>
    %26 = arith.addf %23, %25 : vector<16x32xf32>
    %c0_17 = arith.constant 0 : index
    %c0_18 = arith.constant 0 : index
    %27 = vector.load %arg6[%c0_17, %c0_18] : memref<1x32xf32, #tpu.memory_space<vmem>>, vector<1x32xf32>
    %28 = vector.broadcast %27 : vector<1x32xf32> to vector<16x32xf32>
    %29 = arith.addf %26, %28 : vector<16x32xf32>
    %30 = arith.mulf %29, %9 : vector<16x32xf32>
    %cst_19 = arith.constant 0.000000e+00 : f32
    %31 = vector.broadcast %cst_19 : f32 to vector<16x32xf32>
    %32 = arith.maximumf %30, %31 : vector<16x32xf32>
    %33 = math.absf %30 : vector<16x32xf32>
    %cst_20 = arith.constant 0.000000e+00 : f32
    %34 = vector.broadcast %cst_20 : f32 to vector<16x32xf32>
    %35 = arith.subf %34, %33 : vector<16x32xf32>
    %36 = math.exp %35 : vector<16x32xf32>
    %37 = math.log1p %36 : vector<16x32xf32>
    %38 = arith.addf %32, %37 : vector<16x32xf32>
    %c0_21 = arith.constant 0 : index
    %c0_22 = arith.constant 0 : index
    %c0_23 = arith.constant 0 : index
    %39 = vector.load %arg7[%c0_21, %c0_22, %c0_23] : memref<2x32x32xf32, #tpu.memory_space<vmem>>, vector<1x32x32xf32>
    %40 = vector.shape_cast %39 : vector<1x32x32xf32> to vector<32x32xf32>
    %cst_24 = arith.constant dense<0.000000e+00> : vector<16x32xf32>
    %41 = tpu.matmul %38, %40, %cst_24 {dimension_numbers = #tpu.dot_dimension_numbers<[1], [0], [0], [1], [0, 0, 1, 1], [], []>} : vector<16x32xf32>, vector<32x32xf32>, vector<16x32xf32> -> vector<16x32xf32>
    %c0_25 = arith.constant 0 : index
    %c0_26 = arith.constant 0 : index
    %c0_27 = arith.constant 0 : index
    %42 = vector.load %arg8[%c0_25, %c0_26, %c0_27] : memref<2x1x32xf32, #tpu.memory_space<vmem>>, vector<1x1x32xf32>
    %43 = vector.shape_cast %42 : vector<1x1x32xf32> to vector<1x32xf32>
    %44 = vector.broadcast %43 : vector<1x32xf32> to vector<16x32xf32>
    %45 = arith.addf %41, %44 : vector<16x32xf32>
    %46 = arith.mulf %45, %15 : vector<16x32xf32>
    %cst_28 = arith.constant 0.000000e+00 : f32
    %47 = vector.broadcast %cst_28 : f32 to vector<16x32xf32>
    %48 = arith.maximumf %46, %47 : vector<16x32xf32>
    %49 = math.absf %46 : vector<16x32xf32>
    %cst_29 = arith.constant 0.000000e+00 : f32
    %50 = vector.broadcast %cst_29 : f32 to vector<16x32xf32>
    %51 = arith.subf %50, %49 : vector<16x32xf32>
    %52 = math.exp %51 : vector<16x32xf32>
    %53 = math.log1p %52 : vector<16x32xf32>
    %54 = arith.addf %48, %53 : vector<16x32xf32>
    %c1_30 = arith.constant 1 : index
    %c0_31 = arith.constant 0 : index
    %c0_32 = arith.constant 0 : index
    %55 = vector.load %arg7[%c1_30, %c0_31, %c0_32] : memref<2x32x32xf32, #tpu.memory_space<vmem>>, vector<1x32x32xf32>
    %56 = vector.shape_cast %55 : vector<1x32x32xf32> to vector<32x32xf32>
    %cst_33 = arith.constant dense<0.000000e+00> : vector<16x32xf32>
    %57 = tpu.matmul %54, %56, %cst_33 {dimension_numbers = #tpu.dot_dimension_numbers<[1], [0], [0], [1], [0, 0, 1, 1], [], []>} : vector<16x32xf32>, vector<32x32xf32>, vector<16x32xf32> -> vector<16x32xf32>
    %c1_34 = arith.constant 1 : index
    %c0_35 = arith.constant 0 : index
    %c0_36 = arith.constant 0 : index
    %58 = vector.load %arg8[%c1_34, %c0_35, %c0_36] : memref<2x1x32xf32, #tpu.memory_space<vmem>>, vector<1x1x32xf32>
    %59 = vector.shape_cast %58 : vector<1x1x32xf32> to vector<1x32xf32>
    %60 = vector.broadcast %59 : vector<1x32xf32> to vector<16x32xf32>
    %61 = arith.addf %57, %60 : vector<16x32xf32>
    %62 = arith.mulf %61, %21 : vector<16x32xf32>
    %cst_37 = arith.constant 0.000000e+00 : f32
    %63 = vector.broadcast %cst_37 : f32 to vector<16x32xf32>
    %64 = arith.maximumf %62, %63 : vector<16x32xf32>
    %65 = math.absf %62 : vector<16x32xf32>
    %cst_38 = arith.constant 0.000000e+00 : f32
    %66 = vector.broadcast %cst_38 : f32 to vector<16x32xf32>
    %67 = arith.subf %66, %65 : vector<16x32xf32>
    %68 = math.exp %67 : vector<16x32xf32>
    %69 = math.log1p %68 : vector<16x32xf32>
    %70 = arith.addf %64, %69 : vector<16x32xf32>
    %c0_39 = arith.constant 0 : index
    %c0_40 = arith.constant 0 : index
    %71 = vector.load %arg9[%c0_39, %c0_40] : memref<32x4xf32, #tpu.memory_space<vmem>>, vector<32x4xf32>
    %cst_41 = arith.constant dense<0.000000e+00> : vector<16x4xf32>
    %72 = tpu.matmul %70, %71, %cst_41 {dimension_numbers = #tpu.dot_dimension_numbers<[1], [0], [0], [1], [0, 0, 1, 1], [], []>} : vector<16x32xf32>, vector<32x4xf32>, vector<16x4xf32> -> vector<16x4xf32>
    %c0_42 = arith.constant 0 : index
    %c0_43 = arith.constant 0 : index
    %73 = vector.load %arg10[%c0_42, %c0_43] : memref<1x4xf32, #tpu.memory_space<vmem>>, vector<1x4xf32>
    %74 = vector.broadcast %73 : vector<1x4xf32> to vector<16x4xf32>
    %75 = arith.addf %72, %74 : vector<16x4xf32>
    %76 = vector.shape_cast %75 : vector<16x4xf32> to vector<2x8x4xf32>
    %c0_44 = arith.constant 0 : index
    %c0_45 = arith.constant 0 : index
    %c0_46 = arith.constant 0 : index
    %77 = vector.load %arg11[%c0_44, %c0_45, %c0_46] : memref<2x8x4xf32, #tpu.memory_space<vmem>>, vector<2x8x4xf32>
    tpu.vector_store %arg11[%c0_44, %c0_45, %c0_46], %76 {strides = array<i32>} : memref<2x8x4xf32, #tpu.memory_space<vmem>>, vector<2x8x4xf32>,
    return
  }
  func.func @transform_0(%arg0: i32) -> (i32, i32, i32) {
    %c0_i32 = arith.constant 0 : i32
    %c0_i32_0 = arith.constant 0 : i32
    %c0_i32_1 = arith.constant 0 : i32
    return %arg0, %c0_i32, %c0_i32_0 : i32, i32, i32
  }
  func.func @transform_1(%arg0: i32) -> (i32, i32, i32) {
    %c0_i32 = arith.constant 0 : i32
    %c0_i32_0 = arith.constant 0 : i32
    %c0_i32_1 = arith.constant 0 : i32
    return %arg0, %c0_i32, %c0_i32_0 : i32, i32, i32
  }
  func.func @transform_2(%arg0: i32) -> (i32, i32, i32) {
    %c0_i32 = arith.constant 0 : i32
    %c0_i32_0 = arith.constant 0 : i32
    %c0_i32_1 = arith.constant 0 : i32
    return %arg0, %c0_i32, %c0_i32_0 : i32, i32, i32
  }
  func.func @transform_3(%arg0: i32) -> (i32, i32) {
    %c0_i32 = arith.constant 0 : i32
    %c0_i32_0 = arith.constant 0 : i32
    %c0_i32_1 = arith.constant 0 : i32
    return %c0_i32, %c0_i32_0 : i32, i32
  }
  func.func @transform_4(%arg0: i32) -> (i32, i32) {
    %c0_i32 = arith.constant 0 : i32
    %c0_i32_0 = arith.constant 0 : i32
    %c0_i32_1 = arith.constant 0 : i32
    return %c0_i32, %c0_i32_0 : i32, i32
  }
  func.func @transform_5(%arg0: i32) -> (i32, i32) {
    %c0_i32 = arith.constant 0 : i32
    %c0_i32_0 = arith.constant 0 : i32
    %c0_i32_1 = arith.constant 0 : i32
    return %c0_i32, %c0_i32_0 : i32, i32
  }
  func.func @transform_6(%arg0: i32) -> (i32, i32, i32) {
    %c0_i32 = arith.constant 0 : i32
    %c0_i32_0 = arith.constant 0 : i32
    %c0_i32_1 = arith.constant 0 : i32
    %c0_i32_2 = arith.constant 0 : i32
    return %c0_i32, %c0_i32_0, %c0_i32_1 : i32, i32, i32
  }
  func.func @transform_7(%arg0: i32) -> (i32, i32, i32) {
    %c0_i32 = arith.constant 0 : i32
    %c0_i32_0 = arith.constant 0 : i32
    %c0_i32_1 = arith.constant 0 : i32
    %c0_i32_2 = arith.constant 0 : i32
    return %c0_i32, %c0_i32_0, %c0_i32_1 : i32, i32, i32
  }
  func.func @transform_8(%arg0: i32) -> (i32, i32) {
    %c0_i32 = arith.constant 0 : i32
    %c0_i32_0 = arith.constant 0 : i32
    %c0_i32_1 = arith.constant 0 : i32
    return %c0_i32, %c0_i32_0 : i32, i32
  }
  func.func @transform_9(%arg0: i32) -> (i32, i32) {
    %c0_i32 = arith.constant 0 : i32
    %c0_i32_0 = arith.constant 0 : i32
    %c0_i32_1 = arith.constant 0 : i32
    return %c0_i32, %c0_i32_0 : i32, i32
  }
  func.func @transform_10(%arg0: i32) -> (i32, i32, i32) {
    %c0_i32 = arith.constant 0 : i32
    %c0_i32_0 = arith.constant 0 : i32
    %c0_i32_1 = arith.constant 0 : i32
    return %arg0, %c0_i32, %c0_i32_0 : i32, i32, i32
  }
}

</mosaic_0001>

<bundles_post_ra>
// kernel: tpu_custom_call.1
= control target key start
LH: loop header
LB: loop body
LE: loop exit
PB: predicated region body
PF: predicated region fallthrough
CT: control target
= control target key end

     0   :  { %vm78_vm0 = vcmask 1043456   ;;  %vm71_vm1 = vcmask 31744   ;;  %vm293_vm4 = vcmask 261120   ;;  %s932_s4 = inlined_call_operand.vmem [shape: f32[4,32], index: 4, kind: input, shape index: {}]   ;;  %s933_s1 = inlined_call_operand.vmem [shape: f32[2,8,4], index: 1, kind: input, shape index: {}]   ;;  %s934_s3 = inlined_call_operand.vmem [shape: f32[4,32], index: 3, kind: input, shape index: {}]   ;;  %s935_s0 = inlined_call_operand.vmem [shape: f32[2,8,4], index: 0, kind: input, shape index: {}]   ;;  %s936_s6 = inlined_call_operand.vmem [shape: f32[2,32,32], index: 6, kind: input, shape index: {}]   ;;  %s937_s5 = inlined_call_operand.vmem [shape: f32[1,32], index: 5, kind: input, shape index: {}]   ;;  %s938_s2 = inlined_call_operand.vmem [shape: f32[2,3,32], index: 2, kind: input, shape index: {}]   ;;  %s939_s7 = inlined_call_operand.vmem [shape: f32[2,1,32], index: 7, kind: input, shape index: {}]   ;;  %s940_s8 = inlined_call_operand.vmem [shape: f32[32,4], index: 8, kind: input, shape index: {}]   ;;  %s941_s9 = inlined_call_operand.vmem [shape: f32[1,4], index: 9, kind: input, shape index: {}]   ;;  %s942_s10 = inlined_call_operand.vmem [shape: f32[2,8,4], index: 10, kind: output, shape index: {}]  }
   0x1   :  { %v70_v0 = vld [vmem:[%s932_s4] sm:$0xf]  ;;  %v38_v2 = vld [vmem:[%s933_s1 + $0x8] sm:$0xff]  ;;  %v284_v9 = vld [vmem:[%s936_s6 + $0x10] sm:$0xff] }
   0x2   :  { %v37_v1 = vld [vmem:[%s933_s1] sm:$0xff]  ;;  %682 = vmatprep.subr.msk.mxu0 %vm78_vm0, %v70_v0  ;;  %v36_v5 = vld [vmem:[%s935_s0 + $0x8] sm:$0xff]  ;;  %v285_v10 = vld [vmem:[%s936_s6 + $0x18] sm:$0xff] }
   0x3   :  { %684 = vmatprep.mubr.msk.f32.mxu0 %vm71_vm1, %v37_v1  ;;  %v69_v3 = vld [vmem:[%s934_s3] sm:$0xf]  ;;  %683 = vmatpush3.msk.msra.mxu0 %vm78_vm0, %v70_v0  ;;  %v283_v7 = vld [vmem:[%s936_s6 + $0x8] sm:$0xff]  ;;  %v729_v11 = vpack.c.bf16 %v285_v10, %v284_v9  ;;  %v632_v13 = vld [vmem:[%s938_s2 + $0x4] ss:$0 sm:$0xff] }
   0x4   :  { %v35_v4 = vld [vmem:[%s935_s0] sm:$0xff]  ;;  %685 = vmatmul.mubr.msk.f32.vlgmr.msra.gmra.mrb[0].mxu0 %vm71_vm1, %v38_v2  ;;  %687 = vmatprep.subr.msk.mxu0 %vm78_vm0, %v69_v3  ;;  %v648_v50 = vld [vmem:[%s936_s6 + $0x28] sm:$0xff]  ;;  %v649_v52 = vld [vmem:[%s936_s6 + $0x30] sm:$0xff] }
   0x5   :  { %688 = vmatpush3.msk.msra.mxu0 %vm78_vm0, %v69_v3  ;;  %689 = vmatprep.mubr.msk.f32.mxu0 %vm71_vm1, %v35_v4  ;;  %v282_v6 = vld [vmem:[%s936_s6] sm:$0xff]  ;;  %v650_v53 = vld [vmem:[%s936_s6 + $0x38] sm:$0xff] }
   0x6   :  { %v725_v8 = vpack.c.bf16 %v283_v7, %v282_v6  ;;  %v643_v12 = vld [vmem:[%s937_s5] ss:$0 sm:$0xff]  ;;  %v737_v54 = vpack.c.bf16 %v650_v53, %v649_v52  ;;  %v634_v56 = vld [vmem:[%s938_s2 + $0x5] ss:$0 sm:$0xff]  ;;  %v633_v59 = vld [vmem:[%s938_s2 + $0x1] ss:$0 sm:$0xff] }
   0x7   :  { %v631_v16 = vld [vmem:[%s938_s2] ss:$0 sm:$0xff] }
   0x8   :  { %726 = vmatprep.subr.bf16.mxu1 %v725_v8  ;;  %v647_v49 = vld [vmem:[%s936_s6 + $0x20] sm:$0xff] }
   0x9   :  { %728 = vmatpush3.bf16.msra.mxu1 %v725_v8  ;;  %v733_v51 = vpack.c.bf16 %v648_v50, %v647_v49  ;;  %v644_v55 = vld [vmem:[%s939_s7] ss:$0 sm:$0xff] }
   0xa   :  { %730 = vmatprep.subr.bf16.mxu1 %v729_v11 }
   0xb   :  { %734 = vmatprep.subr.bf16.mxu0 %v733_v51 }
   0xc   :  { %690 = vmatmul.mubr.msk.f32.vlgmr.msra.gmra.mrb[0].mxu0 %vm71_vm1, %v36_v5 }
   0xd   :  { %732 = vmatpush3.bf16.msra.mxu1 %v729_v11  ;;  %736 = vmatpush3.bf16.msra.mxu0 %v733_v51 }
   0xe   :  { %738 = vmatprep.subr.bf16.mxu0 %v737_v54 }
  0x11   :  { %740 = vmatpush3.bf16.msra.mxu0 %v737_v54 }
  0xdf   :  { %v691_v14 = vpop.f32.mrb[0].mxu0 }
  0xe0   :  { %v249_v15 = vadd.f32 %v691_v14, %v643_v12  ;;  %v232_v17 = vpop.f32.mrb[1].mxu0 }
  0xe1   :  { %v248_v18 = vadd.f32 %v643_v12, %v232_v17 }
  0xe2   :  { %v251_v19 = vmul.f32 %v632_v13, %v249_v15 }
  0xe3   :  { %v250_v20 = vmul.f32 %v631_v16, %v248_v18 }
  0xe4   :  { %v255_v21 = vand.u32 2147483647, %v251_v19  ;;  %v253_v45 = vmax.f32 %v251_v19, 0.0 }
  0xe5   :  { %v254_v22 = vand.u32 2147483647, %v250_v20  ;;  %v252_v44 = vmax.f32 %v250_v20, 0.0 }
  0xe6   :  { %v257_v23 = vsub.f32 0.0, %v255_v21 }
  0xe7   :  { %v256_v24 = vsub.f32 0.0, %v254_v22 }
  0xe8   :  { %v260_v25 = vmul.f32 1.442695, %v257_v23 }
  0xe9   :  { %v258_v26 = vmul.f32 1.442695, %v256_v24 }
  0xea   :  { %751 = vpow2.f32 %v260_v25 }
  0xeb   :  { %753 = vpow2.f32 %v258_v26 }
  0xf4   :  { %v752_v27 = vpop.eup %751 }
  0xf5   :  { %v754_v28 = vpop.eup %753  ;;  %v271_v29 = vadd.f32 1.0, %v752_v27  ;;  %v274_v31 = vmul.f32 -0.5, %v752_v27  ;;  %v277_v34 = vand.u32 2147483647, %v752_v27 }
  0xf6   :  { %v262_v30 = vadd.f32 1.0, %v754_v28  ;;  %v265_v32 = vmul.f32 -0.5, %v754_v28  ;;  %v268_v36 = vand.u32 2147483647, %v754_v28 }
  0xf7   :  { %755 = vlog2.f32 %v271_v29  ;;  %v275_v33 = vadd.f32 1.0, %v274_v31  ;;  %vm278_vm2 = vcmp.lt.f32.partialorder %v277_v34, 0.0004427343  ;;  %v534_v29 = vld [vmem:[%s940_s8 + $0x8] sm:$0xff]  ;;  %v535_v31 = vld [vmem:[%s940_s8 + $0x10] sm:$0xff] }
  0xf8   :  { %757 = vlog2.f32 %v262_v30  ;;  %v266_v35 = vadd.f32 1.0, %v265_v32  ;;  %vm269_vm3 = vcmp.lt.f32.partialorder %v268_v36, 0.0004427343  ;;  %v536_v32 = vld [vmem:[%s940_s8 + $0x18] sm:$0xff]  ;;  %v652_v34 = vld [vmem:[%s939_s7 + $0x1] ss:$0 sm:$0xff] }
  0xf9   :  { %v276_v40 = vmul.f32 %v752_v27, %v275_v33  ;;  %v745_v33 = vpack.c.bf16 %v536_v32, %v535_v31 }
  0xfa   :  { %v267_v42 = vmul.f32 %v754_v28, %v266_v35  ;;  %v533_v28 = vld [vmem:[%s940_s8] sm:$0xff] }
  0xfb   :  { %v741_v30 = vpack.c.bf16 %v534_v29, %v533_v28  ;;  %v636_v35 = vld [vmem:[%s938_s2 + $0x6] ss:$0 sm:$0xff] }
  0xfd   :  { %742 = vmatprep.subr.bf16.mxu1 %v741_v30 }
 0x101   :  { %v756_v37 = vpop.eup %755 }
 0x102   :  { %v758_v38 = vpop.eup %757  ;;  %v273_v39 = vmul.f32 0.6931472, %v756_v37 }
 0x103   :  { %v264_v41 = vmul.f32 0.6931472, %v758_v38  ;;  %v635_v38 = vld [vmem:[%s938_s2 + $0x2] ss:$0 sm:$0xff] }
 0x104   :  { %v279_v43 = vsel %vm278_vm2, %v276_v40, %v273_v39 }
 0x105   :  { %v270_v46 = vsel %vm269_vm3, %v267_v42, %v264_v41  ;;  %v281_v48 = vadd.f32 %v279_v43, %v253_v45 }
 0x106   :  { %v280_v47 = vadd.f32 %v270_v46, %v252_v44 }
 0x108   :  { %700 = vmatprep.mubr.msk.f32.mxu1 %vm293_vm4, %v280_v47 }
 0x109   :  { %701 = vmatmul.mubr.msk.f32.vlgmr.msra.gmra.mrb[0].mxu1 %vm293_vm4, %v281_v48 }
 0x10a   :  { %744 = vmatpush3.bf16.msra.mxu1 %v741_v30 }
 0x10b   :  { %746 = vmatprep.subr.bf16.mxu1 %v745_v33 }
 0x10e   :  { %748 = vmatpush3.bf16.msra.mxu1 %v745_v33 }
 0x1dc   :  { %v702_v57 = vpop.f32.mrb[0].mxu1 }
 0x1dd   :  { %v372_v58 = vadd.f32 %v702_v57, %v644_v55  ;;  %v366_v60 = vpop.f32.mrb[1].mxu1 }
 0x1de   :  { %v367_v61 = vadd.f32 %v644_v55, %v366_v60 }
 0x1df   :  { %v376_v62 = vmul.f32 %v634_v56, %v372_v58 }
 0x1e0   :  { %v375_v63 = vmul.f32 %v633_v59, %v367_v61 }
 0x1e1   :  { %v380_v0 = vand.u32 2147483647, %v376_v62  ;;  %v378_v24 = vmax.f32 %v376_v62, 0.0 }
 0x1e2   :  { %v379_v1 = vand.u32 2147483647, %v375_v63  ;;  %v377_v23 = vmax.f32 %v375_v63, 0.0 }
 0x1e3   :  { %v382_v2 = vsub.f32 0.0, %v380_v0 }
 0x1e4   :  { %v381_v3 = vsub.f32 0.0, %v379_v1 }
 0x1e5   :  { %v385_v4 = vmul.f32 1.442695, %v382_v2 }
 0x1e6   :  { %v383_v5 = vmul.f32 1.442695, %v381_v3 }
 0x1e7   :  { %759 = vpow2.f32 %v385_v4 }
 0x1e8   :  { %761 = vpow2.f32 %v383_v5 }
 0x1f1   :  { %v760_v6 = vpop.eup %759 }
 0x1f2   :  { %v762_v7 = vpop.eup %761  ;;  %v396_v8 = vadd.f32 1.0, %v760_v6  ;;  %v399_v10 = vmul.f32 -0.5, %v760_v6  ;;  %v402_v13 = vand.u32 2147483647, %v760_v6 }
 0x1f3   :  { %v387_v9 = vadd.f32 1.0, %v762_v7  ;;  %v390_v11 = vmul.f32 -0.5, %v762_v7  ;;  %v393_v15 = vand.u32 2147483647, %v762_v7 }
 0x1f4   :  { %763 = vlog2.f32 %v396_v8  ;;  %v400_v12 = vadd.f32 1.0, %v399_v10  ;;  %vm403_vm5 = vcmp.lt.f32.partialorder %v402_v13, 0.0004427343 }
 0x1f5   :  { %765 = vlog2.f32 %v387_v9  ;;  %v391_v14 = vadd.f32 1.0, %v390_v11  ;;  %vm394_vm6 = vcmp.lt.f32.partialorder %v393_v15, 0.0004427343 }
 0x1f6   :  { %v401_v19 = vmul.f32 %v760_v6, %v400_v12 }
 0x1f7   :  { %v392_v21 = vmul.f32 %v762_v7, %v391_v14  ;;  %v655_v7 = vld [vmem:[%s941_s9] ss:$0 sm:$0xff] }
 0x1fe   :  { %v764_v16 = vpop.eup %763 }
 0x1ff   :  { %v766_v17 = vpop.eup %765  ;;  %v398_v18 = vmul.f32 0.6931472, %v764_v16 }
 0x200   :  { %v389_v20 = vmul.f32 0.6931472, %v766_v17 }
 0x201   :  { %v404_v22 = vsel %vm403_vm5, %v401_v19, %v398_v18 }
 0x202   :  { %v395_v25 = vsel %vm394_vm6, %v392_v21, %v389_v20  ;;  %v406_v27 = vadd.f32 %v404_v22, %v378_v24 }
 0x203   :  { %v405_v26 = vadd.f32 %v395_v25, %v377_v23 }
 0x205   :  { %711 = vmatprep.mubr.msk.f32.mxu0 %vm293_vm4, %v405_v26 }
 0x206   :  { %712 = vmatmul.mubr.msk.f32.vlgmr.msra.gmra.mrb[2].mxu0 %vm293_vm4, %v406_v27 }
 0x2d9   :  { %v713_v36 = vpop.f32.mrb[2].mxu0 }
 0x2da   :  { %v498_v37 = vadd.f32 %v713_v36, %v652_v34  ;;  %v492_v39 = vpop.f32.mrb[3].mxu0 }
 0x2db   :  { %v493_v40 = vadd.f32 %v652_v34, %v492_v39 }
 0x2dc   :  { %v502_v41 = vmul.f32 %v636_v35, %v498_v37 }
 0x2dd   :  { %v501_v42 = vmul.f32 %v635_v38, %v493_v40 }
 0x2de   :  { %v506_v43 = vand.u32 2147483647, %v502_v41  ;;  %v504_v3 = vmax.f32 %v502_v41, 0.0 }
 0x2df   :  { %v505_v44 = vand.u32 2147483647, %v501_v42  ;;  %v503_v2 = vmax.f32 %v501_v42, 0.0 }
 0x2e0   :  { %v508_v45 = vsub.f32 0.0, %v506_v43 }
 0x2e1   :  { %v507_v46 = vsub.f32 0.0, %v505_v44 }
 0x2e2   :  { %v511_v47 = vmul.f32 1.442695, %v508_v45 }
 0x2e3   :  { %v509_v48 = vmul.f32 1.442695, %v507_v46 }
 0x2e4   :  { %767 = vpow2.f32 %v511_v47 }
 0x2e5   :  { %769 = vpow2.f32 %v509_v48 }
 0x2ee   :  { %v768_v49 = vpop.eup %767 }
 0x2ef   :  { %v770_v50 = vpop.eup %769  ;;  %v522_v51 = vadd.f32 1.0, %v768_v49  ;;  %v525_v53 = vmul.f32 -0.5, %v768_v49  ;;  %v528_v56 = vand.u32 2147483647, %v768_v49 }
 0x2f0   :  { %v513_v52 = vadd.f32 1.0, %v770_v50  ;;  %v516_v54 = vmul.f32 -0.5, %v770_v50  ;;  %v519_v58 = vand.u32 2147483647, %v770_v50 }
 0x2f1   :  { %771 = vlog2.f32 %v522_v51  ;;  %v526_v55 = vadd.f32 1.0, %v525_v53  ;;  %vm529_vm7 = vcmp.lt.f32.partialorder %v528_v56, 0.0004427343 }
 0x2f2   :  { %773 = vlog2.f32 %v513_v52  ;;  %v517_v57 = vadd.f32 1.0, %v516_v54  ;;  %vm520_vm8 = vcmp.lt.f32.partialorder %v519_v58, 0.0004427343 }
 0x2f3   :  { %v527_v62 = vmul.f32 %v768_v49, %v526_v55 }
 0x2f4   :  { %v518_v0 = vmul.f32 %v770_v50, %v517_v57 }
 0x2fb   :  { %v772_v59 = vpop.eup %771 }
 0x2fc   :  { %v774_v60 = vpop.eup %773  ;;  %v524_v61 = vmul.f32 0.6931472, %v772_v59 }
 0x2fd   :  { %v515_v63 = vmul.f32 0.6931472, %v774_v60 }
 0x2fe   :  { %v530_v1 = vsel %vm529_vm7, %v527_v62, %v524_v61 }
 0x2ff   :  { %v521_v4 = vsel %vm520_vm8, %v518_v0, %v515_v63  ;;  %v532_v6 = vadd.f32 %v530_v1, %v504_v3 }
 0x300   :  { %v531_v5 = vadd.f32 %v521_v4, %v503_v2 }
 0x302   :  { %722 = vmatprep.mubr.msk.f32.mxu1 %vm293_vm4, %v531_v5 }
 0x303   :  { %723 = vmatmul.mubr.msk.f32.vlgmr.msra.gmra.mrb[2].mxu1 %vm293_vm4, %v532_v6 }
 0x3d6   :  { %v724_v8 = vpop.f32.mrb[2].mxu1 }
 0x3d7   :  { %v622_v9 = vadd.f32 %v724_v8, %v655_v7  ;;  %v616_v10 = vpop.f32.mrb[3].mxu1 }
 0x3d8   :  { %v617_v11 = vadd.f32 %v655_v7, %v616_v10 }
 0x3d9   :  { %626 = vst.msk [vmem:[%s942_s10 + $0x8] sm:$0xff] %vm71_vm1, %v622_v9 }
 0x3da   :  { %625 = vst.msk [vmem:[%s942_s10] sm:$0xff] %vm71_vm1, %v617_v11 }

</bundles_post_ra>
